<compile_context>
chip_gen: v7x
topology: tpu7x:2x2x1
jax: 0.10.0
libtpu: 0.0.40
codegen_flags: <defaults>
</compile_context>

<pallas_src>
import functools

import jax
import jax.numpy as jnp
from jax.experimental import pallas as pl
from jax.experimental.pallas import tpu as pltpu


def _round_up(x, m):
    return ((x + m - 1) // m) * m


def _device_info():
    """Returns (vmem_capacity_bytes, multi_tensorcore) with safe fallbacks."""
    try:
        vmem = int(pltpu.get_tpu_info().vmem_capacity_bytes)
    except Exception:
        vmem = 64 << 20  # conservative default (v7x per-TC VMEM)
    try:
        kind = jax.devices()[0].device_kind.lower()
    except Exception:
        kind = ""
    multi_tc = any(t in kind for t in ("v4", "v5p", "v7"))
    return vmem, multi_tc


def _spec(shape, index_map, *, single_buffered=False):
    """BlockSpec helper; grid-invariant operands get a single VMEM buffer."""
    if single_buffered:
        try:
            return pl.BlockSpec(shape, index_map, pipeline_mode=pl.Buffered(1))
        except (TypeError, AttributeError):  # older BlockSpec signature
            pass
    return pl.BlockSpec(shape, index_map)


# --------------------------------------------------------------------------
# Kernels
# --------------------------------------------------------------------------
def mlp_kernel_resident(x_ref, w1_ref, b1_ref, w2_ref, b2_ref, w3_ref, b3_ref,
                        o_ref):
    """All three weights resident in VMEM; grid iterates over batch tiles."""
    h = jnp.dot(x_ref[...], w1_ref[...], preferred_element_type=jnp.float32)
    h = jnp.maximum(h + b1_ref[...], 0.0).astype(jnp.bfloat16)
    h = jnp.dot(h, w2_ref[...], preferred_element_type=jnp.float32)
    h = jnp.maximum(h + b2_ref[...], 0.0).astype(jnp.bfloat16)
    out = jnp.dot(h, w3_ref[...], preferred_element_type=jnp.float32)
    o_ref[...] = (out + b3_ref[...]).astype(o_ref.dtype)


def mlp_kernel_hidden_tiled(x_ref, w1_ref, b1_ref, w2_ref, b2_ref, w3_ref,
                            b3_ref, o_ref, h1_ref, acc_ref):
    """Fallback: w1 resident, w2/w3 streamed in hidden-dim tiles (axis 1)."""
    j = pl.program_id(1)

    @pl.when(j == 0)
    def _():
        h1 = jnp.dot(x_ref[...], w1_ref[...], preferred_element_type=jnp.float32)
        h1 = jnp.maximum(h1 + b1_ref[...], 0.0)
        h1_ref[...] = h1.astype(jnp.bfloat16)
        acc_ref[...] = jnp.zeros_like(acc_ref)

    h2 = jnp.dot(h1_ref[...], w2_ref[...], preferred_element_type=jnp.float32)
    h2 = jnp.maximum(h2 + b2_ref[...], 0.0).astype(jnp.bfloat16)
    acc_ref[...] += jnp.dot(h2, w3_ref[...], preferred_element_type=jnp.float32)

    @pl.when(j == pl.num_programs(1) - 1)
    def _():
        o_ref[...] = (acc_ref[...] + b3_ref[...]).astype(o_ref.dtype)


# --------------------------------------------------------------------------
# Host-side wrappers
# --------------------------------------------------------------------------
def pack_params(params):
    """One-time packing: pad weights/biases to lane-dense (128-multiple) layout
    and cast weights to bf16.  Call once per model, NOT per forward pass."""
    in_sz, hid = params["w1"].shape
    out_sz = params["w3"].shape[1]
    in_p, hid_p, out_p = (_round_up(d, 128) for d in (in_sz, hid, out_sz))

    def pad(a, rows, cols, dtype):
        buf = jnp.zeros((rows, cols), dtype)
        return buf.at[:a.shape[0], :a.shape[1]].set(a.astype(dtype))

    packed = {
        "w1": pad(params["w1"], in_p, hid_p, jnp.bfloat16),
        "b1": pad(params["b1"], 1, hid_p, jnp.float32),
        "w2": pad(params["w2"], hid_p, hid_p, jnp.bfloat16),
        "b2": pad(params["b2"], 1, hid_p, jnp.float32),
        "w3": pad(params["w3"], hid_p, out_p, jnp.bfloat16),
        "b3": pad(params["b3"], 1, out_p, jnp.float32),
    }
    return packed, (in_sz, hid, out_sz)


@functools.partial(jax.jit, static_argnames=("dims", "force_hidden_tiling"))
def chat_model_forward(x, packed, dims, force_hidden_tiling=False):
    """x: [B, input_size] f32. packed: output of pack_params(). dims: (in,hid,out)."""
    in_sz, _hid, out_sz = dims
    B = x.shape[0]
    in_p, hid_p = packed["w1"].shape
    out_p = packed["w3"].shape[1]

    vmem_cap, multi_tc = _device_info()
    vmem_budget = int(vmem_cap * 0.85)  # headroom for Mosaic internal scratch

    weight_bytes = (in_p * hid_p + hid_p * hid_p + hid_p * out_p) * 2  # bf16
    bias_bytes = (2 * hid_p + out_p) * 4                               # f32
    resident_fits = (weight_bytes + bias_bytes) <= int(vmem_cap * 0.60)
    use_hidden_tiling = force_hidden_tiling or not resident_fits

    b8 = _round_up(B, 8)

    def pad_x(B_pad):
        if B_pad == B and in_p == in_sz:
            return x.astype(jnp.bfloat16)  # already aligned: cast only, no copy
        return jnp.zeros((B_pad, in_p), jnp.bfloat16).at[:B, :in_sz].set(
            x.astype(jnp.bfloat16))

    def resident_map(i, *_):
        return (0, 0)

    if not use_hidden_tiling:
        # ---- resident-weights path: grid over the batch only ----
        # per-row VMEM: x tile (2-buf bf16) + out tile (2-buf f32) + f32/bf16 h temps
        per_row = 4 * in_p + 8 * out_p + 12 * hid_p
        avail = vmem_budget - weight_bytes - bias_bytes - (2 << 20)
        tile_b = max(8, min(2048, (avail // per_row) // 8 * 8, b8))
        if multi_tc and b8 >= 512 and tile_b >= b8:
            # split across the two TensorCores only when each half is >=256 rows
            tile_b = _round_up(pl.cdiv(b8, 2), 8)
        B_pad = _round_up(B, tile_b)
        x_p = pad_x(B_pad)

        vmem_est = (weight_bytes + bias_bytes + 2 * tile_b * in_p * 2
                    + 2 * tile_b * out_p * 4 + tile_b * hid_p * 12)
        vmem_limit = int(min(int(vmem_est * 1.3) + (4 << 20), vmem_budget))

        flops = 2 * B_pad * (in_p * hid_p + hid_p * hid_p + hid_p * out_p)
        bytes_accessed = (B_pad * in_p * 2 + weight_bytes + bias_bytes
                          + B_pad * out_p * 4)

        out_padded = pl.pallas_call(
            mlp_kernel_resident,
            out_shape=jax.ShapeDtypeStruct((B_pad, out_p), jnp.float32),
            grid_spec=pltpu.PrefetchScalarGridSpec(
                num_scalar_prefetch=0,
                grid=(B_pad // tile_b,),
                in_specs=[
                    pl.BlockSpec((tile_b, in_p), lambda i: (i, 0)),
                    _spec((in_p, hid_p), resident_map, single_buffered=True),
                    _spec((1, hid_p), resident_map, single_buffered=True),
                    _spec((hid_p, hid_p), resident_map, single_buffered=True),
                    _spec((1, hid_p), resident_map, single_buffered=True),
                    _spec((hid_p, out_p), resident_map, single_buffered=True),
                    _spec((1, out_p), resident_map, single_buffered=True),
                ],
                out_specs=pl.BlockSpec((tile_b, out_p), lambda i: (i, 0)),
            ),
            compiler_params=pltpu.CompilerParams(
                dimension_semantics=("parallel",),
                vmem_limit_bytes=vmem_limit,
            ),
            cost_estimate=pl.CostEstimate(flops=flops, transcendentals=0,
                                          bytes_accessed=bytes_accessed),
        )(x_p, packed["w1"], packed["b1"], packed["w2"], packed["b2"],
          packed["w3"], packed["b3"])
    else:
        # ---- fallback for large hidden (e.g. hid >= 4k on v7x's 64 MiB):
        # keep w1 resident, stream w2/w3 in hidden-dim tiles over a reduction
        # grid axis, accumulate layer3 output in f32 scratch. ----
        tile_h = 128
        for cand in range(min(hid_p, 512), 0, -128):
            if hid_p % cand == 0:
                tile_h = cand
                break
        if force_hidden_tiling:
            tile_h = 128  # exercise the multi-step reduction in tests

        w1_bytes = in_p * hid_p * 2
        fixed = (w1_bytes + hid_p * 4 + out_p * 4      # resident w1 / b1 / b3
                 + 2 * hid_p * tile_h * 2              # w2 tiles (2-buf bf16)
                 + 2 * tile_h * out_p * 2              # w3 tiles (2-buf bf16)
                 + 2 * tile_h * 4)                     # b2 tiles
        # per-row: x/out tiles + h1 bf16 scratch + h1 f32 temp + acc + h2 temps
        per_row = 4 * in_p + 12 * out_p + 6 * hid_p + 6 * tile_h
        avail = vmem_budget - fixed - (2 << 20)
        tile_b = max(8, min(1024, (avail // per_row) // 8 * 8, b8))
        B_pad = _round_up(B, tile_b)
        x_p = pad_x(B_pad)
        n_btiles = B_pad // tile_b

        vmem_est = fixed + tile_b * per_row
        vmem_limit = int(min(int(vmem_est * 1.3) + (4 << 20), vmem_budget))

        flops = 2 * B_pad * (in_p * hid_p + hid_p * hid_p + hid_p * out_p)
        bytes_accessed = (B_pad * in_p * 2 + w1_bytes
                          + n_btiles * (hid_p * hid_p + hid_p * out_p) * 2
                          + bias_bytes + B_pad * out_p * 4)

        out_padded = pl.pallas_call(
            mlp_kernel_hidden_tiled,
            out_shape=jax.ShapeDtypeStruct((B_pad, out_p), jnp.float32),
            grid_spec=pltpu.PrefetchScalarGridSpec(
                num_scalar_prefetch=0,
                grid=(n_btiles, hid_p // tile_h),
                in_specs=[
                    pl.BlockSpec((tile_b, in_p), lambda i, j: (i, 0)),
                    _spec((in_p, hid_p), resident_map, single_buffered=True),
                    _spec((1, hid_p), resident_map, single_buffered=True),
                    pl.BlockSpec((hid_p, tile_h), lambda i, j: (0, j)),
                    pl.BlockSpec((1, tile_h), lambda i, j: (0, j)),
                    pl.BlockSpec((tile_h, out_p), lambda i, j: (j, 0)),
                    _spec((1, out_p), resident_map, single_buffered=True),
                ],
                out_specs=pl.BlockSpec((tile_b, out_p), lambda i, j: (i, 0)),
                scratch_shapes=[
                    pltpu.VMEM((tile_b, hid_p), jnp.bfloat16),  # h1 (layer1 act)
                    pltpu.VMEM((tile_b, out_p), jnp.float32),   # layer3 accumulator
                ],
            ),
            compiler_params=pltpu.CompilerParams(
                dimension_semantics=("parallel", "arbitrary"),
                vmem_limit_bytes=vmem_limit,
            ),
            cost_estimate=pl.CostEstimate(flops=flops, transcendentals=0,
                                          bytes_accessed=bytes_accessed),
        )(x_p, packed["w1"], packed["b1"], packed["w2"], packed["b2"],
          packed["w3"], packed["b3"])

    # Strip batch / feature padding.
    return out_padded[:B, :out_sz]


def init_params(key, input_size, hidden_size, output_size):
    """Deterministic init mimicking nn.Linear default U(-1/sqrt(fan_in), +)."""
    ks = jax.random.split(key, 6)

    def linear(kw, kb, fan_in, fan_out):
        bound = 1.0 / jnp.sqrt(fan_in)
        # Stored already transposed: [fan_in, fan_out]
        w = jax.random.uniform(kw, (fan_in, fan_out), jnp.float32, -bound, bound)
        b = jax.random.uniform(kb, (1, fan_out), jnp.float32, -bound, bound)
        return w, b

    w1, b1 = linear(ks[0], ks[1], input_size, hidden_size)
    w2, b2 = linear(ks[2], ks[3], hidden_size, hidden_size)
    w3, b3 = linear(ks[4], ks[5], hidden_size, output_size)
    return {"w1": w1, "b1": b1, "w2": w2, "b2": b2, "w3": w3, "b3": b3}


if __name__ == "__main__":
    key = jax.random.PRNGKey(0)

    def reference(x, params):
        h = jnp.maximum(x @ params["w1"] + params["b1"], 0.0)
        h = jnp.maximum(h @ params["w2"] + params["b2"], 0.0)
        return h @ params["w3"] + params["b3"]

    def reference_bf16(x, params):
        f = lambda a: a.astype(jnp.bfloat16).astype(jnp.float32)
        h = jnp.maximum(f(x) @ f(params["w1"]) + params["b1"], 0.0)
        h = jnp.maximum(f(h) @ f(params["w2"]) + params["b2"], 0.0)
        return f(h) @ f(params["w3"]) + params["b3"]

    # --- small shapes consistent with the module: resident-weights path ---
    input_size, hidden_size, output_size, batch = 32, 64, 16, 8
    kx, kp, kx2, kp2 = jax.random.split(key, 4)
    x = jax.random.normal(kx, (batch, input_size), jnp.float32)
    params = init_params(kp, input_size, hidden_size, output_size)
    packed, dims = pack_params(params)  # one-time packing, outside hot path

    out = jax.block_until_ready(chat_model_forward(x, packed, dims))
    assert out.shape == (batch, output_size)
    # bf16-matched reference (tight tol) and f32 PyTorch-semantics reference (loose)
    assert jnp.allclose(out, reference_bf16(x, params), atol=1e-2, rtol=1e-2)
    assert jnp.allclose(out, reference(x, params), atol=5e-2, rtol=5e-2)

    # --- also exercise the hidden-tiled fallback path (used when resident
    # weights would not fit VMEM, e.g. hid >= 4k on v7x) ---
    x2 = jax.random.normal(kx2, (16, input_size), jnp.float32)
    params2 = init_params(kp2, input_size, 256, output_size)
    packed2, dims2 = pack_params(params2)
    out2 = jax.block_until_ready(
        chat_model_forward(x2, packed2, dims2, force_hidden_tiling=True))
    assert out2.shape == (16, output_size)
    assert jnp.allclose(out2, reference(x2, params2), atol=5e-2, rtol=5e-2)

    print("KERNEL_OK")
</pallas_src>

<mosaic_0001>
module attributes {stable_mosaic.version = 11 : i64} {
  func.func @mlp_kernel_resident(%arg0: i32, %arg1: memref<8x128xbf16, #tpu.memory_space<vmem>>, %arg2: memref<128x128xbf16, #tpu.memory_space<vmem>>, %arg3: memref<1x128xf32, #tpu.memory_space<vmem>>, %arg4: memref<128x128xbf16, #tpu.memory_space<vmem>>, %arg5: memref<1x128xf32, #tpu.memory_space<vmem>>, %arg6: memref<128x128xbf16, #tpu.memory_space<vmem>>, %arg7: memref<1x128xf32, #tpu.memory_space<vmem>>, %arg8: memref<8x128xf32, #tpu.memory_space<vmem>>) attributes {dimension_semantics = [#tpu.dimension_semantics<parallel>], iteration_bounds = array<i64: 1>, scalar_prefetch = 0 : i64, scratch_operands = 0 : i64, tpu.core_type = #tpu.core_type<tc>, window_params = [{transform_indices = @transform_0, window_bounds = array<i64: 8, 128>}, {pipeline_mode = #tpu.pipeline_mode<synchronous>, transform_indices = @transform_1, window_bounds = array<i64: 128, 128>}, {pipeline_mode = #tpu.pipeline_mode<synchronous>, transform_indices = @transform_2, window_bounds = array<i64: 1, 128>}, {pipeline_mode = #tpu.pipeline_mode<synchronous>, transform_indices = @transform_3, window_bounds = array<i64: 128, 128>}, {pipeline_mode = #tpu.pipeline_mode<synchronous>, transform_indices = @transform_4, window_bounds = array<i64: 1, 128>}, {pipeline_mode = #tpu.pipeline_mode<synchronous>, transform_indices = @transform_5, window_bounds = array<i64: 128, 128>}, {pipeline_mode = #tpu.pipeline_mode<synchronous>, transform_indices = @transform_6, window_bounds = array<i64: 1, 128>}, {transform_indices = @transform_7, window_bounds = array<i64: 8, 128>}]} {
    %c0 = arith.constant 0 : index
    %c0_0 = arith.constant 0 : index
    %0 = vector.load %arg1[%c0, %c0_0] : memref<8x128xbf16, #tpu.memory_space<vmem>>, vector<8x128xbf16>
    %c0_1 = arith.constant 0 : index
    %c0_2 = arith.constant 0 : index
    %1 = vector.load %arg2[%c0_1, %c0_2] : memref<128x128xbf16, #tpu.memory_space<vmem>>, vector<128x128xbf16>
    %cst = arith.constant dense<0.000000e+00> : vector<8x128xf32>
    %2 = tpu.matmul %0, %1, %cst {dimension_numbers = #tpu.dot_dimension_numbers<[1], [0], [0], [1], [0, 0, 1, 1], [], []>} : vector<8x128xbf16>, vector<128x128xbf16>, vector<8x128xf32> -> vector<8x128xf32>
    %c0_3 = arith.constant 0 : index
    %c0_4 = arith.constant 0 : index
    %3 = vector.load %arg3[%c0_3, %c0_4] : memref<1x128xf32, #tpu.memory_space<vmem>>, vector<1x128xf32>
    %4 = vector.broadcast %3 : vector<1x128xf32> to vector<8x128xf32>
    %5 = arith.addf %2, %4 : vector<8x128xf32>
    %cst_5 = arith.constant 0.000000e+00 : f32
    %6 = vector.broadcast %cst_5 : f32 to vector<8x128xf32>
    %7 = arith.maximumf %5, %6 : vector<8x128xf32>
    %8 = arith.truncf %7 : vector<8x128xf32> to vector<8x128xbf16>
    %c0_6 = arith.constant 0 : index
    %c0_7 = arith.constant 0 : index
    %9 = vector.load %arg4[%c0_6, %c0_7] : memref<128x128xbf16, #tpu.memory_space<vmem>>, vector<128x128xbf16>
    %cst_8 = arith.constant dense<0.000000e+00> : vector<8x128xf32>
    %10 = tpu.matmul %8, %9, %cst_8 {dimension_numbers = #tpu.dot_dimension_numbers<[1], [0], [0], [1], [0, 0, 1, 1], [], []>} : vector<8x128xbf16>, vector<128x128xbf16>, vector<8x128xf32> -> vector<8x128xf32>
    %c0_9 = arith.constant 0 : index
    %c0_10 = arith.constant 0 : index
    %11 = vector.load %arg5[%c0_9, %c0_10] : memref<1x128xf32, #tpu.memory_space<vmem>>, vector<1x128xf32>
    %12 = vector.broadcast %11 : vector<1x128xf32> to vector<8x128xf32>
    %13 = arith.addf %10, %12 : vector<8x128xf32>
    %cst_11 = arith.constant 0.000000e+00 : f32
    %14 = vector.broadcast %cst_11 : f32 to vector<8x128xf32>
    %15 = arith.maximumf %13, %14 : vector<8x128xf32>
    %16 = arith.truncf %15 : vector<8x128xf32> to vector<8x128xbf16>
    %c0_12 = arith.constant 0 : index
    %c0_13 = arith.constant 0 : index
    %17 = vector.load %arg6[%c0_12, %c0_13] : memref<128x128xbf16, #tpu.memory_space<vmem>>, vector<128x128xbf16>
    %cst_14 = arith.constant dense<0.000000e+00> : vector<8x128xf32>
    %18 = tpu.matmul %16, %17, %cst_14 {dimension_numbers = #tpu.dot_dimension_numbers<[1], [0], [0], [1], [0, 0, 1, 1], [], []>} : vector<8x128xbf16>, vector<128x128xbf16>, vector<8x128xf32> -> vector<8x128xf32>
    %c0_15 = arith.constant 0 : index
    %c0_16 = arith.constant 0 : index
    %19 = vector.load %arg7[%c0_15, %c0_16] : memref<1x128xf32, #tpu.memory_space<vmem>>, vector<1x128xf32>
    %20 = vector.broadcast %19 : vector<1x128xf32> to vector<8x128xf32>
    %21 = arith.addf %18, %20 : vector<8x128xf32>
    %c0_17 = arith.constant 0 : index
    %c0_18 = arith.constant 0 : index
    %22 = vector.load %arg8[%c0_17, %c0_18] : memref<8x128xf32, #tpu.memory_space<vmem>>, vector<8x128xf32>
    tpu.vector_store %arg8[%c0_17, %c0_18], %21 {strides = array<i32>} : memref<8x128xf32, #tpu.memory_space<vmem>>, vector<8x128xf32>,
    return
  }
  func.func @transform_0(%arg0: i32) -> (i32, i32) {
    %c0_i32 = arith.constant 0 : i32
    %c0_i32_0 = arith.constant 0 : i32
    return %arg0, %c0_i32 : i32, i32
  }
  func.func @transform_1(%arg0: i32) -> (i32, i32) {
    %c0_i32 = arith.constant 0 : i32
    %c0_i32_0 = arith.constant 0 : i32
    %c0_i32_1 = arith.constant 0 : i32
    return %c0_i32, %c0_i32_0 : i32, i32
  }
  func.func @transform_2(%arg0: i32) -> (i32, i32) {
    %c0_i32 = arith.constant 0 : i32
    %c0_i32_0 = arith.constant 0 : i32
    %c0_i32_1 = arith.constant 0 : i32
    return %c0_i32, %c0_i32_0 : i32, i32
  }
  func.func @transform_3(%arg0: i32) -> (i32, i32) {
    %c0_i32 = arith.constant 0 : i32
    %c0_i32_0 = arith.constant 0 : i32
    %c0_i32_1 = arith.constant 0 : i32
    return %c0_i32, %c0_i32_0 : i32, i32
  }
  func.func @transform_4(%arg0: i32) -> (i32, i32) {
    %c0_i32 = arith.constant 0 : i32
    %c0_i32_0 = arith.constant 0 : i32
    %c0_i32_1 = arith.constant 0 : i32
    return %c0_i32, %c0_i32_0 : i32, i32
  }
  func.func @transform_5(%arg0: i32) -> (i32, i32) {
    %c0_i32 = arith.constant 0 : i32
    %c0_i32_0 = arith.constant 0 : i32
    %c0_i32_1 = arith.constant 0 : i32
    return %c0_i32, %c0_i32_0 : i32, i32
  }
  func.func @transform_6(%arg0: i32) -> (i32, i32) {
    %c0_i32 = arith.constant 0 : i32
    %c0_i32_0 = arith.constant 0 : i32
    %c0_i32_1 = arith.constant 0 : i32
    return %c0_i32, %c0_i32_0 : i32, i32
  }
  func.func @transform_7(%arg0: i32) -> (i32, i32) {
    %c0_i32 = arith.constant 0 : i32
    %c0_i32_0 = arith.constant 0 : i32
    return %arg0, %c0_i32 : i32, i32
  }
}

</mosaic_0001>

<bundles_post_ra>
// kernel: chat_model_forward.1
= control target key start
LH: loop header
LB: loop body
LE: loop exit
PB: predicated region body
PF: predicated region fallthrough
CT: control target
= control target key end

     0   :  { %12 = vsyncpa [#allocation3], 0  ;;  %s818_s0 = inlined_call_operand.vmem [shape: bf16[8,128], index: 0, kind: input, shape index: {}]   ;;  %s819_s1 = inlined_call_operand.hbm [shape: bf16[128,128], index: 1, kind: input, shape index: {}]   ;;  %s820_s2 = inlined_call_operand.vmem [shape: f32[1,128], index: 2, kind: input, shape index: {}]   ;;  %s821_s3 = inlined_call_operand.hbm [shape: bf16[128,128], index: 3, kind: input, shape index: {}]   ;;  %s822_s4 = inlined_call_operand.vmem [shape: f32[1,128], index: 4, kind: input, shape index: {}]   ;;  %s823_s5 = inlined_call_operand.hbm [shape: bf16[128,128], index: 5, kind: input, shape index: {}]   ;;  %s824_s6 = inlined_call_operand.vmem [shape: f32[1,128], index: 6, kind: input, shape index: {}]   ;;  %s825_s7 = inlined_call_operand.hbm [shape: f32[8,128], index: 7, kind: output, shape index: {}]  }
   0x1   :  { %13 = vsyncpa [#allocation6], 0 }
   0x2   :  { %14 = vsyncpa [#allocation4], 0  ;;  %s664_s24 = smov [#allocation5]   ;;  %s665_s26 = smov [#allocation2]  }
   0x3   :  { %s36_s25 = sshll.u32 %s664_s24, 4  ;;  %s22_s27 = sshll.u32 %s665_s26, 4  ;;  %s37_s25 = int_to_ptr.vmem [resolvable:$true] %s36_s25  ;;  %s712_s27 = int_to_ptr.vmem [resolvable:$true] %s22_s27 }
   0x4   :  { %s570_s30 = scalar_lea.hbm %s821_s3, 1024 }
   0x5   :  { %p571_p0 = scmp.ne.s32.totalorder %s821_s3, %s570_s30  ;;  %p574_p1 = scmp.lt.u32.totalorder %s570_s30, %s821_s3 }
   0x7   :  { %p576_p2 = pnand %p574_p1, %p571_p0 }
   0x9   :  { %579 = shalt.err (!%p576_p2)
}
   0xa   :  { %s580_s12 = scalar_lea.vmem %s37_s25, 1024  ;;  %p585_p4 = scmp.lt.s32.totalorder %s37_s25, %s37_s25 }
   0xb   :  { %p581_p3 = scmp.ne.s32.totalorder %s37_s25, %s580_s12  ;;  %p586_p5 = scmp.lt.s32.totalorder %s580_s12, %s580_s12 }
   0xd   :  { %p587_p6 = por %p586_p5, %p585_p4 }
   0xf   :  { %p588_p7 = pnand %p587_p6, %p581_p3 }
  0x11   :  { %591 = shalt.err (!%p588_p7)
}
  0x12   :  { %s666_s13 = smov 64   ;;  %s667_s14 = smov 4  }
  0x13   :  { %42 = dma.hbm_to_vmem [thread:$0]  %s821_s3, 1024, %s37_s25, [#allocation6], %s666_s13, %s666_s13, %s667_s14  }
  0x14   :  { %s592_s19 = scalar_lea.hbm %s819_s1, 1024 }
  0x15   :  { %p593_p8 = scmp.ne.s32.totalorder %s819_s1, %s592_s19  ;;  %p596_p9 = scmp.lt.u32.totalorder %s592_s19, %s819_s1 }
  0x17   :  { %p598_p10 = pnand %p596_p9, %p593_p8 }
  0x19   :  { %601 = shalt.err (!%p598_p10)
}
  0x1a   :  { %s602_s24 = scalar_lea.vmem %s712_s27, 1024  ;;  %p607_p12 = scmp.lt.s32.totalorder %s712_s27, %s712_s27 }
  0x1b   :  { %p603_p11 = scmp.ne.s32.totalorder %s712_s27, %s602_s24  ;;  %p608_p13 = scmp.lt.s32.totalorder %s602_s24, %s602_s24 }
  0x1d   :  { %p609_p0 = por %p608_p13, %p607_p12 }
  0x1f   :  { %p610_p1 = pnand %p609_p0, %p603_p11 }
  0x21   :  { %613 = shalt.err (!%p610_p1)
}
  0x22   :  { %28 = dma.hbm_to_vmem [thread:$0]  %s819_s1, 1024, %s712_s27, [#allocation3], %s666_s13, %s666_s13, %s667_s14  }
  0x23   :  { %s668_s26 = smov [#allocation7]   ;;  %s614_s8 = scalar_lea.hbm %s823_s5, 1024 }
  0x24   :  { %s50_s28 = sshll.u32 %s668_s26, 4  ;;  %p615_p2 = scmp.ne.s32.totalorder %s823_s5, %s614_s8  ;;  %s51_s28 = int_to_ptr.vmem [resolvable:$true] %s50_s28 }
  0x25   :  { %p618_p3 = scmp.lt.u32.totalorder %s614_s8, %s823_s5 }
  0x27   :  { %p620_p4 = pnand %p618_p3, %p615_p2 }
  0x29   :  { %623 = shalt.err (!%p620_p4)
}
  0x2a   :  { %s624_s15 = scalar_lea.vmem %s51_s28, 1024  ;;  %p629_p6 = scmp.lt.s32.totalorder %s51_s28, %s51_s28 }
  0x2b   :  { %p625_p5 = scmp.ne.s32.totalorder %s51_s28, %s624_s15  ;;  %p630_p7 = scmp.lt.s32.totalorder %s624_s15, %s624_s15 }
  0x2d   :  { %p631_p8 = por %p630_p7, %p629_p6 }
  0x2f   :  { %p632_p9 = pnand %p631_p8, %p625_p5 }
  0x31   :  { %635 = shalt.err (!%p632_p9)
}
  0x32   :  { %56 = dma.hbm_to_vmem [thread:$0]  %s823_s5, 1024, %s51_s28, [#allocation6], %s666_s13, %s666_s13, %s667_s14  }
  0x33   :  { %658 = dma.done.wait [#allocation3], 1024  }
  0x34   :  { %659 = vsyncadd [#allocation3], 4294966272 }
  0x35   :  { %660 = dma.done.wait [#allocation6], 2048  }
  0x36   :  { %661 = vsyncadd [#allocation6], 4294965248  ;;  %v669_v0 = vmov 0.0   ;;  %vm670_vm0 = vmmov 0   ;;  %v546_v1 = vld [vmem:[#allocation2] sm:$0xff]   ;;  %v547_v2 = vld [vmem:[#allocation2 + $0x8] sm:$0xff]  }
  0x37   :  { %478 = vmatprep.subr.bf16.mxu0 %v669_v0  ;;  %494 = vmatprep.mubr.msk.bf16.mxu0 %vm670_vm0, %v669_v0  ;;  %v548_v3 = vld [vmem:[#allocation2 + $0x10] sm:$0xff]   ;;  %v554_v4 = vld [vmem:[#allocation5] sm:$0xff]   ;;  %v549_v5 = vld [vmem:[#allocation2 + $0x18] sm:$0xff]   ;;  %s671_s19 = smov [#allocation8]  }
  0x38   :  { %498 = vmatprep.subr.bf16.mxu1 %v669_v0  ;;  %514 = vmatprep.mubr.msk.bf16.mxu1 %vm670_vm0, %v669_v0  ;;  %v555_v6 = vld [vmem:[#allocation5 + $0x8] sm:$0xff]   ;;  %v550_v7 = vld [vmem:[#allocation2 + $0x20] sm:$0xff]   ;;  %v556_v8 = vld [vmem:[#allocation5 + $0x10] sm:$0xff]   ;;  %s414_s20 = sshll.u32 %s671_s19, 4  ;;  %s415_s20 = int_to_ptr.vmem [resolvable:$true] %s414_s20 }
  0x39   :  { %479 = vmatpush3.bf16.msra.mxu0 %v546_v1  ;;  %499 = vmatpush3.bf16.msra.mxu1 %v554_v4  ;;  %v551_v9 = vld [vmem:[#allocation2 + $0x28] sm:$0xff]   ;;  %v557_v10 = vld [vmem:[#allocation5 + $0x18] sm:$0xff]   ;;  %v552_v11 = vld [vmem:[#allocation2 + $0x30] sm:$0xff]   ;;  %p641_p11 = scmp.lt.s32.totalorder %s415_s20, %s415_s20 }
  0x3a   :  { %480 = vmatprep.subr.bf16.mxu0 %v669_v0  ;;  %500 = vmatprep.subr.bf16.mxu1 %v669_v0  ;;  %v558_v12 = vld [vmem:[#allocation5 + $0x20] sm:$0xff]   ;;  %v553_v13 = vld [vmem:[#allocation2 + $0x38] sm:$0xff]   ;;  %v559_v14 = vld [vmem:[#allocation5 + $0x28] sm:$0xff]  }
  0x3b   :  { %v69_v15 = vld [vmem:[%s818_s0] sm:$0xf]  ;;  %v560_v16 = vld [vmem:[#allocation5 + $0x30] sm:$0xff]   ;;  %v561_v17 = vld [vmem:[#allocation5 + $0x38] sm:$0xff]  }
  0x3c   :  { %v562_v18 = vld [vmem:[#allocation7] sm:$0xff]   ;;  %v563_v19 = vld [vmem:[#allocation7 + $0x8] sm:$0xff]   ;;  %v564_v20 = vld [vmem:[#allocation7 + $0x10] sm:$0xff]  }
  0x3d   :  { %481 = vmatpush3.bf16.msra.mxu0 %v547_v2  ;;  %501 = vmatpush3.bf16.msra.mxu1 %v555_v6  ;;  %v565_v21 = vld [vmem:[#allocation7 + $0x18] sm:$0xff]   ;;  %v566_v22 = vld [vmem:[#allocation7 + $0x20] sm:$0xff]   ;;  %v567_v23 = vld [vmem:[#allocation7 + $0x28] sm:$0xff]  }
  0x3e   :  { %482 = vmatprep.subr.bf16.mxu0 %v669_v0  ;;  %502 = vmatprep.subr.bf16.mxu1 %v669_v0  ;;  %v424_v24 = vld [vmem:[%s820_s2] ss:$0 sm:$0xff]  ;;  %v568_v32 = vld [vmem:[#allocation7 + $0x30] sm:$0xff]   ;;  %v569_v33 = vld [vmem:[#allocation7 + $0x38] sm:$0xff]  }
  0x3f   :  { %v433_v34 = vld [vmem:[%s822_s4] ss:$0 sm:$0xff]  ;;  %s636_s4 = scalar_lea.vmem %s415_s20, 128 }
  0x40   :  { %v442_v42 = vld [vmem:[%s824_s6] ss:$0 sm:$0xff]  ;;  %p637_p10 = scmp.ne.s32.totalorder %s415_s20, %s636_s4  ;;  %p642_p12 = scmp.lt.s32.totalorder %s636_s4, %s636_s4 }
  0x41   :  { %483 = vmatpush3.bf16.msra.mxu0 %v548_v3  ;;  %503 = vmatpush3.bf16.msra.mxu1 %v556_v8 }
  0x42   :  { %484 = vmatprep.subr.bf16.mxu0 %v669_v0  ;;  %504 = vmatprep.subr.bf16.mxu1 %v669_v0  ;;  %p643_p13 = por %p642_p12, %p641_p11 }
  0x44   :  { %p644_p0 = pnand %p643_p13, %p637_p10 }
  0x45   :  { %485 = vmatpush3.bf16.msra.mxu0 %v549_v5  ;;  %505 = vmatpush3.bf16.msra.mxu1 %v557_v10 }
  0x46   :  { %486 = vmatprep.subr.bf16.mxu0 %v669_v0  ;;  %506 = vmatprep.subr.bf16.mxu1 %v669_v0 }
  0x49   :  { %487 = vmatpush3.bf16.msra.mxu0 %v550_v7  ;;  %507 = vmatpush3.bf16.msra.mxu1 %v558_v12 }
  0x4a   :  { %488 = vmatprep.subr.bf16.mxu0 %v669_v0  ;;  %508 = vmatprep.subr.bf16.mxu1 %v669_v0 }
  0x4d   :  { %489 = vmatpush3.bf16.msra.mxu0 %v551_v9  ;;  %509 = vmatpush3.bf16.msra.mxu1 %v559_v14 }
  0x4e   :  { %490 = vmatprep.subr.bf16.mxu0 %v669_v0  ;;  %510 = vmatprep.subr.bf16.mxu1 %v669_v0 }
  0x51   :  { %491 = vmatpush3.bf16.msra.mxu0 %v552_v11  ;;  %511 = vmatpush3.bf16.msra.mxu1 %v560_v16 }
  0x52   :  { %492 = vmatprep.subr.bf16.mxu0 %v669_v0  ;;  %512 = vmatprep.subr.bf16.mxu1 %v669_v0 }
  0x55   :  { %493 = vmatpush3.bf16.msra.mxu0 %v553_v13  ;;  %513 = vmatpush3.bf16.msra.mxu1 %v561_v17 }
  0x56   :  { %518 = vmatprep.subr.bf16.mxu0 %v669_v0 }
  0x58   :  { %495 = vmatmul.mubr.bf16.vlgmr.msra.gmra.mrb[0].mxu0 %v69_v15 }
  0x59   :  { %534 = vmatprep.mubr.msk.bf16.mxu0 %vm670_vm0, %v669_v0  ;;  %519 = vmatpush3.bf16.msra.mxu0 %v562_v18 }
  0x5a   :  { %520 = vmatprep.subr.bf16.mxu0 %v669_v0 }
  0x5d   :  { %521 = vmatpush3.bf16.msra.mxu0 %v563_v19 }
  0x5e   :  { %522 = vmatprep.subr.bf16.mxu0 %v669_v0 }
  0x61   :  { %523 = vmatpush3.bf16.msra.mxu0 %v564_v20 }
  0x62   :  { %524 = vmatprep.subr.bf16.mxu0 %v669_v0 }
  0x65   :  { %525 = vmatpush3.bf16.msra.mxu0 %v565_v21 }
  0x66   :  { %526 = vmatprep.subr.bf16.mxu0 %v669_v0 }
  0x69   :  { %527 = vmatpush3.bf16.msra.mxu0 %v566_v22 }
  0x6a   :  { %528 = vmatprep.subr.bf16.mxu0 %v669_v0 }
  0x6d   :  { %529 = vmatpush3.bf16.msra.mxu0 %v567_v23 }
  0x6e   :  { %530 = vmatprep.subr.bf16.mxu0 %v669_v0 }
  0x71   :  { %531 = vmatpush3.bf16.msra.mxu0 %v568_v32 }
  0x72   :  { %532 = vmatprep.subr.bf16.mxu0 %v669_v0 }
  0x75   :  { %533 = vmatpush3.bf16.msra.mxu0 %v569_v33 }
 0x12b   :  { %v175_v25 = vpop.f32.mrb[0].mxu0 }
 0x12c   :  { %v176_v26 = vadd.f32 %v424_v24, %v175_v25  ;;  %v496_v27 = vpop.f32.mrb[1].mxu0 }
 0x12d   :  { %v178_v28 = vpop.f32.mrb[2].mxu0 }
 0x12e   :  { %v181_v29 = vmax.f32 %v176_v26, 0.0  ;;  %v497_v30 = vpop.f32.mrb[3].mxu0 }
 0x130   :  { %v182_v31 = vpack.c.bf16 %v181_v29, %v181_v29 }
 0x132   :  { %515 = vmatmul.mubr.bf16.vlgmr.msra.gmra.mrb[0].mxu1 %v182_v31 }
 0x205   :  { %v288_v35 = vpop.f32.mrb[0].mxu1 }
 0x206   :  { %v289_v36 = vadd.f32 %v433_v34, %v288_v35  ;;  %v516_v37 = vpop.f32.mrb[1].mxu1 }
 0x207   :  { %v291_v38 = vpop.f32.mrb[2].mxu1 }
 0x208   :  { %v294_v39 = vmax.f32 %v289_v36, 0.0  ;;  %v517_v40 = vpop.f32.mrb[3].mxu1 }
 0x20a   :  { %v295_v41 = vpack.c.bf16 %v294_v39, %v294_v39 }
 0x20c   :  { %535 = vmatmul.mubr.bf16.vlgmr.msra.gmra.mrb[4].mxu0 %v295_v41 }
 0x2df   :  { %v401_v43 = vpop.f32.mrb[4].mxu0 }
 0x2e0   :  { %v402_v44 = vadd.f32 %v442_v42, %v401_v43  ;;  %v536_v45 = vpop.f32.mrb[5].mxu0 }
 0x2e1   :  { %v404_v46 = vpop.f32.mrb[6].mxu0 }
 0x2e2   :  { %407 = vst [vmem:[#allocation8] sm:$0xff] %v402_v44  ;;  %v537_v47 = vpop.f32.mrb[7].mxu0 }
 0x2e3   :  { %647 = shalt.err (!%p644_p0)
}
 0x2e4   :  { %s648_s6 = scalar_lea.hbm %s825_s7, 128 }
 0x2e5   :  { %p649_p1 = scmp.ne.s32.totalorder %s825_s7, %s648_s6  ;;  %p652_p2 = scmp.lt.u32.totalorder %s648_s6, %s825_s7 }
 0x2e7   :  { %p654_p3 = pnand %p652_p2, %p649_p1 }
 0x2e9   :  { %657 = shalt.err (!%p654_p3)
}
 0x2ea   :  { %417 = dma.vmem_to_hbm [thread:$0]  %s415_s20, 128, %s825_s7, [#allocation4]  }
 0x2eb   :  { %662 = dma.done.wait [#allocation4], 128  }
 0x2ec   :  { %663 = vsyncadd [#allocation4], 4294967168 }
 0x2ed   :  { %421 = vsyncpa [#allocation3], 1 }
 0x2ee   :  { %422 = vsyncpa [#allocation6], 1 }
 0x2ef   :  { %423 = vsyncpa [#allocation4], 1 }

</bundles_post_ra>
